<compile_context>
chip_gen: v6e
topology: v6e:2x2x1
jax: 0.10.0
libtpu: 0.0.40
codegen_flags: <defaults>
</compile_context>

<pallas_src>
import functools

import jax
import jax.numpy as jnp
import numpy as np
from jax.experimental import pallas as pl
from jax.experimental.pallas import tpu as pltpu

_WINNER_LANES = 128  # lane-dense winner output width (column 0 holds the real value)


def _ksom_math(x, w, *, lr, neg_inv_two_sigma_sq):
    """One KSOM step on in-register values.

    Args:   x (B, D) f32, w (B, O, D) f32 (B == O)
    Returns (winner (B, 1) int32, new_w (B, O, D) f32)
    """
    diff = w - x[:, None, :]                               # (B, O, D)
    dist = jnp.sum(diff * diff, axis=-1)                   # (B, O)

    # first-occurrence argmin over the grid-column axis (matches torch.argmin)
    o = dist.shape[1]
    col_idx = jax.lax.broadcasted_iota(jnp.int32, dist.shape, 1)
    min_d = jnp.min(dist, axis=1, keepdims=True)           # (B, 1)
    masked = jnp.where(dist == min_d, col_idx, jnp.int32(o))
    winner = jnp.min(masked, axis=1, keepdims=True)        # (B, 1) int32
    # TODO(synk): torch.argmin returns int64; int32 is used here (JAX default, no x64).

    # Gaussian neighborhood: single VALU multiply feeding the EUP exp
    nbhd = jnp.exp(dist * neg_inv_two_sigma_sq)            # (B, O)

    # delta = lr*nbhd*(x - W) = ((-lr)*nbhd) * diff  -> reuse the live `diff`
    # tensor: no MXU round-trip, bit-faithful to the reference formula.
    upd = jnp.sum(((-lr) * nbhd)[:, :, None] * diff, axis=0)   # (O, D)
    new_w = w + upd[None, :, :]                                # every row gets the batch-summed update
    return winner, new_w


def _ksom_step_kernel(x_ref, w_ref, winner_ref, new_w_ref, *, lr, neg_inv_two_sigma_sq):
    winner, new_w = _ksom_math(x_ref[...], w_ref[...],
                               lr=lr, neg_inv_two_sigma_sq=neg_inv_two_sigma_sq)
    # Lane-dense store: broadcast the winner index across 128 lanes (unmasked vst).
    winner_ref[...] = jnp.broadcast_to(winner, winner_ref.shape)
    new_w_ref[...] = new_w


def _ksom_train_kernel(x_ref, w_ref, winner_ref, new_w_ref, w_acc,
                       *, lr, neg_inv_two_sigma_sq):
    step = pl.program_id(0)

    @pl.when(step == 0)
    def _():
        w_acc[...] = w_ref[...]          # seed the resident W accumulator

    winner, new_w = _ksom_math(x_ref[...], w_acc[...],
                               lr=lr, neg_inv_two_sigma_sq=neg_inv_two_sigma_sq)
    winner_ref[...] = jnp.broadcast_to(winner, winner_ref.shape)
    w_acc[...] = new_w                   # carry W to the next step (VMEM resident)

    @pl.when(step == pl.num_programs(0) - 1)
    def _():
        new_w_ref[...] = new_w           # single HBM writeback at the end


@functools.partial(jax.jit,
                   static_argnames=("input_dim", "output_dim", "learning_rate"),
                   donate_argnums=(1,))
def ksom_forward(x, weights, *, input_dim, output_dim, learning_rate):
    """Single forward step (mirrors KSOM.forward). Returns (winner, new_weights)."""
    sigma = output_dim / 2.0
    neg_inv_two_sigma_sq = -1.0 / (2.0 * sigma * sigma)

    x2 = x.reshape(-1, input_dim).astype(jnp.float32)   # mirrors x.view(-1, input_dim)
    b = x2.shape[0]
    o, _, d = weights.shape
    assert b == o, "PyTorch broadcasting in this module requires batch == output_dim"

    kernel = functools.partial(
        _ksom_step_kernel,
        lr=float(learning_rate),
        neg_inv_two_sigma_sq=float(neg_inv_two_sigma_sq),
    )

    winner_pad, new_w = pl.pallas_call(
        kernel,
        out_shape=(
            jax.ShapeDtypeStruct((b, _WINNER_LANES), jnp.int32),
            jax.ShapeDtypeStruct((o, o, d), jnp.float32),
        ),
        in_specs=[
            pl.BlockSpec((b, d), lambda: (0, 0)),
            pl.BlockSpec((o, o, d), lambda: (0, 0, 0)),
        ],
        out_specs=(
            pl.BlockSpec((b, _WINNER_LANES), lambda: (0, 0)),
            pl.BlockSpec((o, o, d), lambda: (0, 0, 0)),
        ),
        # In-place weight update; real (no defensive copy) because the wrapper is
        # jit'ed with the weights argument donated.
        input_output_aliases={1: 1},
    )(x2, weights.astype(jnp.float32))

    return winner_pad[:, 0], new_w


@functools.partial(jax.jit,
                   static_argnames=("input_dim", "output_dim", "learning_rate"),
                   donate_argnums=(1,))
def ksom_train(x_steps, weights, *, input_dim, output_dim, learning_rate):
    """S sequential forward steps folded into ONE pallas_call (W resident in VMEM).

    x_steps: (S, ..., input_dim) -- one batch per step.
    Returns (winners (S, B) int32, final_weights (O, O, D) f32).
    """
    sigma = output_dim / 2.0
    neg_inv_two_sigma_sq = -1.0 / (2.0 * sigma * sigma)

    s = x_steps.shape[0]
    x3 = x_steps.reshape(s, -1, input_dim).astype(jnp.float32)   # (S, B, D)
    b = x3.shape[1]
    o, _, d = weights.shape
    assert b == o, "PyTorch broadcasting in this module requires batch == output_dim"

    kernel = functools.partial(
        _ksom_train_kernel,
        lr=float(learning_rate),
        neg_inv_two_sigma_sq=float(neg_inv_two_sigma_sq),
    )

    winner_pad, new_w = pl.pallas_call(
        kernel,
        grid=(s,),
        out_shape=(
            jax.ShapeDtypeStruct((s, b, _WINNER_LANES), jnp.int32),
            jax.ShapeDtypeStruct((o, o, d), jnp.float32),
        ),
        in_specs=[
            # per-step x tile, streamed + auto double-buffered by the BlockSpec pipeline
            pl.BlockSpec((None, b, d), lambda i: (i, 0, 0)),
            # initial W: constant block index -> fetched once, stays resident
            pl.BlockSpec((o, o, d), lambda i: (0, 0, 0)),
        ],
        out_specs=(
            pl.BlockSpec((None, b, _WINNER_LANES), lambda i: (i, 0, 0)),
            # final W: constant block index -> single writeback after the last step
            pl.BlockSpec((o, o, d), lambda i: (0, 0, 0)),
        ),
        scratch_shapes=[pltpu.VMEM((o, o, d), jnp.float32)],   # resident W accumulator
        input_output_aliases={1: 1},
        compiler_params=pltpu.CompilerParams(dimension_semantics=("arbitrary",)),
    )(x3, weights.astype(jnp.float32))

    return winner_pad[:, :, 0], new_w


def _ksom_reference(x, weights, *, input_dim, output_dim, learning_rate):
    sigma = output_dim / 2.0
    x2 = x.reshape(-1, input_dim)
    diff = weights - x2[:, None, :]
    dist = jnp.sum(diff * diff, axis=-1)
    winner = jnp.argmin(dist, axis=1).astype(jnp.int32)
    nbhd = jnp.exp(-dist / (2.0 * sigma * sigma))
    delta = learning_rate * nbhd[:, :, None] * (x2[:, None, :] - weights)
    new_w = weights + jnp.sum(delta, axis=0)[None, :, :]
    return winner, new_w


if __name__ == "__main__":
    INPUT_DIM = 32
    OUTPUT_DIM = 8
    LEARNING_RATE = 0.1
    BATCH = OUTPUT_DIM  # the module's broadcasting only works when batch == output_dim
    STEPS = 4

    key = jax.random.PRNGKey(0)
    kx, kw, ks = jax.random.split(key, 3)
    x = jax.random.normal(kx, (BATCH, INPUT_DIM), dtype=jnp.float32)
    # deterministic stand-in for torch.randn(output_dim, output_dim, input_dim)
    weights = jax.random.normal(kw, (OUTPUT_DIM, OUTPUT_DIM, INPUT_DIM), dtype=jnp.float32)
    x_steps = jax.random.normal(ks, (STEPS, BATCH, INPUT_DIM), dtype=jnp.float32)

    # ---- references, computed before any donated-weights kernel call ----
    ref_winner, ref_w = _ksom_reference(
        x, weights,
        input_dim=INPUT_DIM, output_dim=OUTPUT_DIM, learning_rate=LEARNING_RATE)
    w_cur = weights
    ref_step_winners = []
    for st in range(STEPS):
        wnr, w_cur = _ksom_reference(
            x_steps[st], w_cur,
            input_dim=INPUT_DIM, output_dim=OUTPUT_DIM, learning_rate=LEARNING_RATE)
        ref_step_winners.append(wnr)
    ref_step_winners = jnp.stack(ref_step_winners)
    ref_final_w = w_cur
    jax.block_until_ready((ref_winner, ref_w, ref_step_winners, ref_final_w))

    # ---- single forward step (mirrors KSOM.forward); weights buffer is donated ----
    winner, new_w = ksom_forward(
        x, weights + 0.0,   # fresh buffer: the argument is donated
        input_dim=INPUT_DIM, output_dim=OUTPUT_DIM, learning_rate=LEARNING_RATE)
    jax.block_until_ready((winner, new_w))
    np.testing.assert_array_equal(np.asarray(winner), np.asarray(ref_winner))
    np.testing.assert_allclose(np.asarray(new_w), np.asarray(ref_w), rtol=1e-5, atol=1e-5)

    # ---- folded multi-step training loop (one pallas_call for all STEPS) ----
    step_winners, final_w = ksom_train(
        x_steps, weights + 0.0,   # fresh buffer: the argument is donated
        input_dim=INPUT_DIM, output_dim=OUTPUT_DIM, learning_rate=LEARNING_RATE)
    jax.block_until_ready((step_winners, final_w))
    np.testing.assert_array_equal(np.asarray(step_winners), np.asarray(ref_step_winners))
    np.testing.assert_allclose(np.asarray(final_w), np.asarray(ref_final_w), rtol=1e-5, atol=1e-5)

    print("KERNEL_OK")
</pallas_src>

<mosaic_0001>
module attributes {stable_mosaic.version = 11 : i64} {
  func.func @_ksom_step_kernel(%arg0: memref<8x32xf32, #tpu.memory_space<vmem>>, %arg1: memref<8x8x32xf32, #tpu.memory_space<vmem>>, %arg2: memref<8x128xi32, #tpu.memory_space<vmem>>, %arg3: memref<8x8x32xf32, #tpu.memory_space<vmem>>) attributes {dimension_semantics = [], scalar_prefetch = 0 : i64, scratch_operands = 0 : i64, tpu.core_type = #tpu.core_type<tc>} {
    %c0 = arith.constant 0 : index
    %c0_0 = arith.constant 0 : index
    %0 = vector.load %arg0[%c0, %c0_0] : memref<8x32xf32, #tpu.memory_space<vmem>>, vector<8x32xf32>
    %c0_1 = arith.constant 0 : index
    %c0_2 = arith.constant 0 : index
    %c0_3 = arith.constant 0 : index
    %1 = vector.load %arg1[%c0_1, %c0_2, %c0_3] : memref<8x8x32xf32, #tpu.memory_space<vmem>>, vector<8x8x32xf32>
    %2 = vector.shape_cast %0 : vector<8x32xf32> to vector<8x1x32xf32>
    %3 = vector.broadcast %2 : vector<8x1x32xf32> to vector<8x8x32xf32>
    %4 = arith.subf %1, %3 : vector<8x8x32xf32>
    %5 = arith.mulf %4, %4 : vector<8x8x32xf32>
    %cst = arith.constant dense<0.000000e+00> : vector<8x8xf32>
    %6 = vector.multi_reduction <add>, %5, %cst [2] : vector<8x8x32xf32> to vector<8x8xf32>
    %7 = tpu.iota {dimensions = array<i32: 1>} : vector<8x8xi32>
    %cst_4 = arith.constant dense<0x7F800000> : vector<8xf32>
    %8 = vector.multi_reduction <minimumf>, %6, %cst_4 [1] : vector<8x8xf32> to vector<8xf32>
    %9 = vector.shape_cast %8 : vector<8xf32> to vector<8x1xf32>
    %10 = vector.broadcast %9 : vector<8x1xf32> to vector<8x8xf32>
    %11 = arith.cmpf oeq, %6, %10 : vector<8x8xf32>
    %c8_i32 = arith.constant 8 : i32
    %12 = vector.broadcast %c8_i32 : i32 to vector<8x8xi32>
    %13 = arith.select %11, %7, %12 : vector<8x8xi1>, vector<8x8xi32>
    %cst_5 = arith.constant dense<2147483647> : vector<8xi32>
    %14 = vector.multi_reduction <minsi>, %13, %cst_5 [1] : vector<8x8xi32> to vector<8xi32>
    %15 = vector.shape_cast %14 : vector<8xi32> to vector<8x1xi32>
    %cst_6 = arith.constant -3.125000e-02 : f32
    %16 = vector.broadcast %cst_6 : f32 to vector<8x8xf32>
    %17 = arith.mulf %6, %16 : vector<8x8xf32>
    %18 = math.exp %17 : vector<8x8xf32>
    %cst_7 = arith.constant -1.000000e-01 : f32
    %19 = vector.broadcast %cst_7 : f32 to vector<8x8xf32>
    %20 = arith.mulf %19, %18 : vector<8x8xf32>
    %21 = vector.shape_cast %20 : vector<8x8xf32> to vector<8x8x1xf32>
    %22 = vector.broadcast %21 : vector<8x8x1xf32> to vector<8x8x32xf32>
    %23 = arith.mulf %22, %4 : vector<8x8x32xf32>
    %cst_8 = arith.constant dense<0.000000e+00> : vector<8x32xf32>
    %24 = vector.multi_reduction <add>, %23, %cst_8 [0] : vector<8x8x32xf32> to vector<8x32xf32>
    %25 = vector.shape_cast %24 : vector<8x32xf32> to vector<1x8x32xf32>
    %26 = vector.broadcast %25 : vector<1x8x32xf32> to vector<8x8x32xf32>
    %27 = arith.addf %1, %26 : vector<8x8x32xf32>
    %28 = vector.shape_cast %15 : vector<8x1xi32> to vector<8x1xi32>
    %29 = vector.broadcast %28 : vector<8x1xi32> to vector<8x128xi32>
    %c0_9 = arith.constant 0 : index
    %c0_10 = arith.constant 0 : index
    %30 = vector.load %arg2[%c0_9, %c0_10] : memref<8x128xi32, #tpu.memory_space<vmem>>, vector<8x128xi32>
    tpu.vector_store %arg2[%c0_9, %c0_10], %29 {strides = array<i32>} : memref<8x128xi32, #tpu.memory_space<vmem>>, vector<8x128xi32>,
    %c0_11 = arith.constant 0 : index
    %c0_12 = arith.constant 0 : index
    %c0_13 = arith.constant 0 : index
    %31 = vector.load %arg3[%c0_11, %c0_12, %c0_13] : memref<8x8x32xf32, #tpu.memory_space<vmem>>, vector<8x8x32xf32>
    tpu.vector_store %arg3[%c0_11, %c0_12, %c0_13], %27 {strides = array<i32>} : memref<8x8x32xf32, #tpu.memory_space<vmem>>, vector<8x8x32xf32>,
    return
  }
}

</mosaic_0001>

<bundles_post_ra>
// kernel: ksom_forward.1
= control target key start
LH: loop header
LB: loop body
LE: loop exit
PB: predicated region body
PF: predicated region fallthrough
CT: control target
= control target key end

     0   :  { %9 = vsyncpa [#allocation3], 0  ;;  %s805_s0 = inlined_call_operand.hbm [shape: f32[8,32], index: 0, kind: input, shape index: {}]   ;;  %s806_s1 = inlined_call_operand.hbm [shape: f32[8,8,32], index: 1, kind: input, shape index: {}, may-alias: {1,3}]   ;;  %s807_s2 = inlined_call_operand.vmem [shape: s32[8,128], index: 2, kind: output, shape index: {0}]   ;;  %s808_s3 = inlined_call_operand.hbm [shape: f32[8,8,32], index: 3, kind: output, shape index: {1}, may-alias: {1,3}]  }
   0x1   :  { %10 = vsyncpa [#allocation6], 0 }
   0x2   :  { %11 = vsyncpa [#allocation4], 0  ;;  %s565_s12 = smov [#allocation2]   ;;  %s566_s14 = smov [#allocation5]  }
   0x3   :  { %s18_s13 = sshll.u32 %s565_s12, 4  ;;  %s27_s15 = sshll.u32 %s566_s14, 4  ;;  %s19_s13 = int_to_ptr.vmem [resolvable:$true] %s18_s13  ;;  %s28_s15 = int_to_ptr.vmem [resolvable:$true] %s27_s15 }
   0x4   :  { %s507_s16 = scalar_lea.vmem %s19_s13, 128  ;;  %p512_p1 = scmp.lt.s32.totalorder %s19_s13, %s19_s13 }
   0x5   :  { %p508_p0 = scmp.ne.s32.totalorder %s19_s13, %s507_s16  ;;  %p513_p2 = scmp.lt.s32.totalorder %s507_s16, %s507_s16 }
   0x7   :  { %p514_p3 = por %p513_p2, %p512_p1 }
   0x9   :  { %p515_p4 = pnand %p514_p3, %p508_p0 }
   0xb   :  { %518 = shalt.err (!%p515_p4)
}
   0xc   :  { %21 = dma.hbm_to_vmem [thread:$0]  %s805_s0, 128, %s19_s13, [#allocation3]  }
   0xd   :  { %s527_s19 = scalar_lea.vmem %s28_s15, 1024  ;;  %p532_p6 = scmp.lt.s32.totalorder %s28_s15, %s28_s15 }
   0xe   :  { %p528_p5 = scmp.ne.s32.totalorder %s28_s15, %s527_s19  ;;  %p533_p7 = scmp.lt.s32.totalorder %s527_s19, %s527_s19 }
  0x10   :  { %p534_p8 = por %p533_p7, %p532_p6 }
  0x12   :  { %p535_p9 = pnand %p534_p8, %p528_p5 }
  0x14   :  { %538 = shalt.err (!%p535_p9)
}
  0x15   :  { %s567_s20 = smov 128   ;;  %s568_s21 = smov 8  }
  0x16   :  { %33 = dma.hbm_to_vmem [thread:$0]  %s806_s1, 1024, %s28_s15, [#allocation6], %s567_s20, %s567_s20, %s568_s21  }
  0x17   :  { %559 = dma.done.wait [#allocation3], 128  }
  0x18   :  { %560 = vsyncadd [#allocation3], 4294967168 }
  0x19   :  { %561 = dma.done.wait [#allocation6], 1024  }
  0x1a   :  { %562 = vsyncadd [#allocation6], 4294966272  ;;  %v54_v0 = vlaneseq  ;;  %v569_v1 = vmov 1966171168   ;;  %v40_v6 = vld [vmem:[#allocation2] sm:$0xff]  ;;  %v608_v13 = vld [vmem:[#allocation5] sm:$0xff] }
  0x1b   :  { %v52_v2 = vunpack.c.l.s4 %v569_v1  ;;  %v50_v9 = vcombine.high %v40_v6, %v40_v6  ;;  %v611_v18 = vld [vmem:[#allocation5 + $0x10] sm:$0xff]  ;;  %v613_v19 = vld [vmem:[#allocation5 + $0x8] sm:$0xff]  ;;  %v620_v25 = vld [vmem:[#allocation5 + $0x20] sm:$0xff]  ;;  %vm155_vm0 = vcmask 261120   ;;  %vm222_vm1 = vcmask 1041409   ;;  %s571_s0 = smov [#allocation7]  }
  0x1c   :  { %v602_v3 = vshrl.u32 %v54_v0, 7  ;;  %v622_v26 = vld [vmem:[#allocation5 + $0x18] sm:$0xff]  ;;  %v634_v34 = vld [vmem:[#allocation5 + $0x28] sm:$0xff]  ;;  %v640_v37 = vld [vmem:[#allocation5 + $0x30] sm:$0xff]  ;;  %v181_v61 = vand.u32 127, %v54_v0  ;;  %vm224_vm2 = vcmask 1042434  }
  0x1d   :  { %v53_v4 = vunpack.c.0.s8 %v52_v2  ;;  %v656_v46 = vld [vmem:[#allocation5 + $0x38] sm:$0xff]  ;;  %vm226_vm3 = vcmask 1043459   ;;  %vm228_vm4 = vcmask 1044484   ;;  %vm230_vm5 = vcmask 1045509   ;;  %s458_s1 = sshll.u32 %s571_s0, 4  ;;  %s459_s1 = int_to_ptr.vmem [resolvable:$true] %s458_s1 }
  0x1e   :  { %v606_v8 = vsub.s32 0, %v602_v3  ;;  %v682_v62 = vsub.s32 %v181_v61, %v602_v3  ;;  %vm232_vm6 = vcmask 1046534   ;;  %vm234_vm7 = vcmask 1047559   ;;  %s539_s24 = scalar_lea.vmem %s459_s1, 1024  ;;  %p544_p11 = scmp.lt.s32.totalorder %s459_s1, %s459_s1 }
  0x1f   :  { %v56_v5 = vsub.s32 %v53_v4, %v602_v3  ;;  %vm237_vm8 = vcmask 64512   ;;  %p540_p10 = scmp.ne.s32.totalorder %s459_s1, %s539_s24  ;;  %p545_p12 = scmp.lt.s32.totalorder %s539_s24, %s539_s24 }
  0x21   :  { %v57_v7 = vrot.slane %v40_v6, %v56_v5  ;;  %v64_v12 = vrot.slane %v50_v9, %v56_v5  ;;  %p546_p13 = por %p545_p12, %p544_p11 }
  0x23   :  { %v73_v10 = vrot.slane %v57_v7, %v56_v5  ;;  %v65_v11 = vcombine.high %v57_v7, %v57_v7  ;;  %v80_v17 = vrot.slane %v64_v12, %v56_v5  ;;  %v66_v20 = vcombine.high %v64_v12, %v64_v12  ;;  %p547_p0 = pnand %p546_p13, %p540_p10 }
  0x25   :  { %v102_v14 = vrot.slane %v73_v10, %v606_v8  ;;  %v95_v15 = vcombine.high %v73_v10, %v73_v10  ;;  %v87_v16 = vrot.slane %v65_v11, %v56_v5  ;;  %v118_v27 = vrot.slane %v80_v17, %v606_v8 }
  0x26   :  { %v94_v28 = vrot.slane %v66_v20, %v56_v5  ;;  %v96_v29 = vcombine.high %v80_v17, %v80_v17 }
  0x27   :  { %v616_v21 = vsub.f32 %v608_v13, %v102_v14  ;;  %v110_v22 = vrot.slane %v95_v15, %v606_v8  ;;  %v106_v23 = vrot.slane %v87_v16, %v606_v8  ;;  %v97_v24 = vcombine.high %v87_v16, %v87_v16 }
  0x28   :  { %v637_v35 = vsub.f32 %v620_v25, %v118_v27  ;;  %v122_v36 = vrot.slane %v94_v28, %v606_v8  ;;  %v126_v38 = vrot.slane %v96_v29, %v606_v8  ;;  %v98_v39 = vcombine.high %v94_v28, %v94_v28 }
  0x29   :  { %v147_v30 = vmul.f32 %v616_v21, %v616_v21  ;;  %v628_v31 = vsub.f32 %v611_v18, %v110_v22  ;;  %v631_v32 = vsub.f32 %v613_v19, %v106_v23  ;;  %v114_v33 = vrot.slane %v97_v24, %v606_v8 }
  0x2a   :  { %v151_v44 = vmul.f32 %v637_v35, %v637_v35  ;;  %v654_v45 = vsub.f32 %v634_v34, %v122_v36  ;;  %v130_v47 = vrot.slane %v98_v39, %v606_v8  ;;  %v664_v51 = vsub.f32 %v640_v37, %v126_v38 }
  0x2b   :  { %v156_v40 = vsel %vm155_vm0, %v147_v30, 0.0  ;;  %v149_v41 = vmul.f32 %v628_v31, %v628_v31  ;;  %v148_v42 = vmul.f32 %v631_v32, %v631_v32  ;;  %v649_v43 = vsub.f32 %v622_v26, %v114_v33 }
  0x2c   :  { %157 = vadd.xlane.f32.xlu0 %v156_v40  ;;  %v152_v53 = vmul.f32 %v654_v45, %v654_v45  ;;  %v670_v54 = vsub.f32 %v656_v46, %v130_v47  ;;  %v168_v55 = vsel %vm155_vm0, %v151_v44, 0.0  ;;  %v153_v56 = vmul.f32 %v664_v51, %v664_v51 }
  0x2d   :  { %v162_v48 = vsel %vm155_vm0, %v149_v41, 0.0  ;;  %v159_v49 = vsel %vm155_vm0, %v148_v42, 0.0  ;;  %v150_v50 = vmul.f32 %v649_v43, %v649_v43 }
  0x2e   :  { %163 = vadd.xlane.f32.xlu1 %v162_v48  ;;  %v171_v57 = vsel %vm155_vm0, %v152_v53, 0.0  ;;  %v154_v58 = vmul.f32 %v670_v54, %v670_v54  ;;  %v174_v59 = vsel %vm155_vm0, %v153_v56, 0.0 }
  0x2f   :  { %v165_v52 = vsel %vm155_vm0, %v150_v50, 0.0 }
  0x30   :  { %160 = vadd.xlane.f32.xlu0 %v159_v49  ;;  %v177_v60 = vsel %vm155_vm0, %v154_v58, 0.0 }
  0x32   :  { %166 = vadd.xlane.f32.xlu1 %v165_v52 }
  0x34   :  { %169 = vadd.xlane.f32.xlu0 %v168_v55 }
  0x36   :  { %172 = vadd.xlane.f32.xlu1 %v171_v57 }
  0x38   :  { %175 = vadd.xlane.f32.xlu0 %v174_v59 }
  0x3a   :  { %178 = vadd.xlane.f32.xlu1 %v177_v60 }
  0x4b   :  { %291 = vbcast.lane.b32.xlu1 %v181_v61, 256 }
  0xb5   :  { %v684_v63 = vpop.xlane.xlu0 %157 }
  0xb6   :  { %v379_v1 = vmul.f32 -0.03125, %v684_v63  ;;  %v193_v6 = vrot.slane %v684_v63, %v682_v62 }
  0xb7   :  { %v687_v2 = vpop.xlane.xlu1 %163 }
  0xb8   :  { %v387_v4 = vmul.f32 1.442695, %v379_v1  ;;  %v381_v5 = vmul.f32 -0.03125, %v687_v2  ;;  %v201_v11 = vrot.slane %v687_v2, %v682_v62 }
  0xb9   :  { %v692_v7 = vpop.xlane.xlu0 %160 }
  0xba   :  { %483 = vpow2.f32 %v387_v4  ;;  %v391_v0 = vmul.f32 1.442695, %v381_v5  ;;  %v197_v9 = vrot.slane %v692_v7, %v682_v62  ;;  %v380_v10 = vmul.f32 -0.03125, %v692_v7 }
  0xbb   :  { %v699_v12 = vpop.xlane.xlu1 %166 }
  0xbc   :  { %485 = vpow2.f32 %v391_v0  ;;  %v223_v14 = vsel %vm222_vm1, %v197_v9, %v193_v6  ;;  %v389_v15 = vmul.f32 1.442695, %v380_v10  ;;  %v205_v16 = vrot.slane %v699_v12, %v682_v62 }
  0xbd   :  { %v225_v17 = vsel %vm224_vm2, %v201_v11, %v223_v14  ;;  %v382_v20 = vmul.f32 -0.03125, %v699_v12  ;;  %v706_v22 = vpop.xlane.xlu0 %169 }
  0xbe   :  { %487 = vpow2.f32 %v389_v15  ;;  %v227_v23 = vsel %vm226_vm3, %v205_v16, %v225_v17  ;;  %v209_v24 = vrot.slane %v706_v22, %v682_v62  ;;  %v383_v27 = vmul.f32 -0.03125, %v706_v22 }
  0xbf   :  { %v393_v28 = vmul.f32 1.442695, %v382_v20  ;;  %v712_v29 = vpop.xlane.xlu1 %172 }
  0xc0   :  { %v229_v30 = vsel %vm228_vm4, %v209_v24, %v227_v23  ;;  %v395_v33 = vmul.f32 1.442695, %v383_v27  ;;  %v213_v36 = vrot.slane %v712_v29, %v682_v62  ;;  %v384_v38 = vmul.f32 -0.03125, %v712_v29 }
  0xc1   :  { %489 = vpow2.f32 %v393_v28  ;;  %v718_v39 = vpop.xlane.xlu0 %175  ;;  %v570_v27 = vmov 0  }
  0xc2   :  { %491 = vpow2.f32 %v395_v33  ;;  %v397_v40 = vmul.f32 1.442695, %v384_v38  ;;  %v217_v41 = vrot.slane %v718_v39, %v682_v62  ;;  %v385_v42 = vmul.f32 -0.03125, %v718_v39  ;;  %481 = vset.pattern.permute.xlu1 %v570_v27  ;;  %480 = vset.pattern.permute.xlu0 %v570_v27 }
  0xc3   :  { %v723_v44 = vpop.xlane.xlu1 %178  ;;  %v231_v47 = vsel %vm230_vm5, %v213_v36, %v229_v30 }
  0xc4   :  { %493 = vpow2.f32 %v397_v40  ;;  %v399_v48 = vmul.f32 1.442695, %v385_v42  ;;  %v221_v49 = vrot.slane %v723_v44, %v682_v62  ;;  %v386_v50 = vmul.f32 -0.03125, %v723_v44 }
  0xc5   :  { %v233_v52 = vsel %vm232_vm6, %v217_v41, %v231_v47 }
  0xc6   :  { %495 = vpow2.f32 %v399_v48  ;;  %v401_v53 = vmul.f32 1.442695, %v386_v50  ;;  %v235_v55 = vsel %vm234_vm7, %v221_v49, %v233_v52 }
  0xc7   :  { %v484_v56 = vpop.eup %483  ;;  %v238_v57 = vsel %vm237_vm8, %v235_v55, inf }
  0xc8   :  { %v403_v58 = vmul.f32 -0.1, %v484_v56  ;;  %497 = vpow2.f32 %v401_v53  ;;  %239 = vmin.xlane.f32.xlu0 %v238_v57 }
  0xc9   :  { %v486_v59 = vpop.eup %485 }
  0xca   :  { %v405_v60 = vmul.f32 -0.1, %v486_v59  ;;  %v411_v1 = vmul.f32 %v403_v58, %v616_v21 }
  0xcb   :  { %v488_v61 = vpop.eup %487 }
  0xcc   :  { %v404_v4 = vmul.f32 -0.1, %v488_v61  ;;  %v413_v6 = vmul.f32 %v405_v60, %v628_v31  ;;  %v419_v11 = vsel %vm155_vm0, %v411_v1, 0.0 }
  0xce   :  { %v490_v5 = vpop.eup %489  ;;  %v412_v0 = vmul.f32 %v404_v4, %v631_v32  ;;  %v422_v23 = vsel %vm155_vm0, %v413_v6, 0.0  ;;  %v260_v4 = vsub.s32 4, %v602_v3  ;;  %v264_v6 = vsub.s32 5, %v602_v3 }
  0xcf   :  { %v492_v9 = vpop.eup %491  ;;  %v406_v10 = vmul.f32 -0.1, %v490_v5 }
  0xd0   :  { %v420_v14 = vsel %vm155_vm0, %v412_v0, 0.0  ;;  %v407_v15 = vmul.f32 -0.1, %v492_v9 }
  0xd1   :  { %v494_v16 = vpop.eup %493  ;;  %v421_v17 = vadd.f32 %v420_v14, %v419_v11  ;;  %v414_v20 = vmul.f32 %v406_v10, %v649_v43  ;;  %v272_v10 = vsub.s32 7, %v602_v3 }
  0xd2   :  { %v415_v21 = vmul.f32 %v407_v15, %v637_v35  ;;  %v408_v24 = vmul.f32 -0.1, %v494_v16 }
  0xd3   :  { %v496_v31 = vpop.eup %495  ;;  %v423_v32 = vadd.f32 %v422_v23, %v421_v17  ;;  %v424_v28 = vsel %vm155_vm0, %v414_v20, 0.0 }
  0xd4   :  { %v426_v30 = vsel %vm155_vm0, %v415_v21, 0.0  ;;  %v416_v33 = vmul.f32 %v408_v24, %v654_v45  ;;  %v409_v36 = vmul.f32 -0.1, %v496_v31 }
  0xd5   :  { %v498_v38 = vpop.eup %497  ;;  %v425_v40 = vadd.f32 %v424_v28, %v423_v32 }
  0xd6   :  { %v417_v43 = vmul.f32 %v409_v36, %v664_v51  ;;  %v410_v41 = vmul.f32 -0.1, %v498_v38  ;;  %v428_v35 = vsel %vm155_vm0, %v416_v33, 0.0 }
  0xd7   :  { %v427_v42 = vadd.f32 %v426_v30, %v425_v40 }
  0xd8   :  { %v430_v47 = vsel %vm155_vm0, %v417_v43, 0.0  ;;  %v418_v48 = vmul.f32 %v410_v41, %v670_v54 }
  0xd9   :  { %v429_v49 = vadd.f32 %v428_v35, %v427_v42 }
  0xda   :  { %v432_v52 = vsel %vm155_vm0, %v418_v48, 0.0 }
  0xdb   :  { %v431_v50 = vadd.f32 %v430_v47, %v429_v49 }
  0xdd   :  { %v433_v53 = vadd.f32 %v432_v52, %v431_v50 }
  0xdf   :  { %v434_v45 = vadd.f32 %v433_v53, %v608_v13  ;;  %v435_v55 = vadd.f32 %v433_v53, %v613_v19  ;;  %v436_v56 = vadd.f32 %v433_v53, %v611_v18  ;;  %v437_v51 = vadd.f32 %v433_v53, %v622_v26 }
  0xe0   :  { %v438_v57 = vadd.f32 %v433_v53, %v620_v25  ;;  %v439_v58 = vadd.f32 %v433_v53, %v634_v34  ;;  %v440_v59 = vadd.f32 %v433_v53, %v640_v37  ;;  %v441_v54 = vadd.f32 %v433_v53, %v656_v46  ;;  %v292_v25 = vpop.permute.xlu1 %291 }
  0xe1   :  { %443 = vst.msk [vmem:[#allocation7] sm:$0xff] %vm155_vm0, %v434_v45  ;;  %444 = vst.msk [vmem:[#allocation7 + $0x8] sm:$0xff] %vm155_vm0, %v435_v55  ;;  %v248_v13 = vsub.s32 1, %v602_v3  ;;  %v252_v18 = vsub.s32 2, %v602_v3  ;;  %v256_v46 = vsub.s32 3, %v602_v3 }
  0xe2   :  { %445 = vst.msk [vmem:[#allocation7 + $0x10] sm:$0xff] %vm155_vm0, %v436_v56  ;;  %446 = vst.msk [vmem:[#allocation7 + $0x18] sm:$0xff] %vm155_vm0, %v437_v51 }
  0xe3   :  { %447 = vst.msk [vmem:[#allocation7 + $0x20] sm:$0xff] %vm155_vm0, %v438_v57  ;;  %448 = vst.msk [vmem:[#allocation7 + $0x28] sm:$0xff] %vm155_vm0, %v439_v58 }
  0xe4   :  { %449 = vst.msk [vmem:[#allocation7 + $0x30] sm:$0xff] %vm155_vm0, %v440_v59  ;;  %450 = vst.msk [vmem:[#allocation7 + $0x38] sm:$0xff] %vm155_vm0, %v441_v54 }
 0x151   :  { %v240_v19 = vpop.xlane.xlu0 %239 }
 0x152   :  { %v249_v26 = vrot.slane %v240_v19, %v248_v13  ;;  %v245_v34 = vrot.slane %v240_v19, %v606_v8  ;;  %v253_v37 = vrot.slane %v240_v19, %v252_v18  ;;  %v257_v1 = vrot.slane %v240_v19, %v256_v46 }
 0x153   :  { %v261_v8 = vrot.slane %v240_v19, %v260_v4 }
 0x154   :  { %vm283_vm9 = vcmp.eq.f32.partialorder %v692_v7, %v249_v26  ;;  %vm282_vm10 = vcmp.eq.f32.partialorder %v684_v63, %v245_v34  ;;  %vm284_vm11 = vcmp.eq.f32.partialorder %v687_v2, %v253_v37  ;;  %vm285_vm12 = vcmp.eq.f32.partialorder %v699_v12, %v257_v1 }
 0x155   :  { %v294_v60 = vsel %vm283_vm9, %v292_v25, 8  ;;  %v293_v61 = vsel %vm282_vm10, %v292_v25, 8  ;;  %v295_v5 = vsel %vm284_vm11, %v292_v25, 8  ;;  %v296_v0 = vsel %vm285_vm12, %v292_v25, 8 }
 0x156   :  { %305 = vperm.xlu1 %481, %v294_v60   ;;  %302 = vperm.xlu0 %480, %v293_v61   ;;  %vm286_vm13 = vcmp.eq.f32.partialorder %v706_v22, %v261_v8  ;;  %v265_v63 = vrot.slane %v240_v19, %v264_v6  ;;  %v268_v7 = vsub.s32 6, %v602_v3  ;;  %v273_v12 = vrot.slane %v240_v19, %v272_v10 }
 0x157   :  { %v297_v9 = vsel %vm286_vm13, %v292_v25, 8 }
 0x158   :  { %vm287_vm14 = vcmp.eq.f32.partialorder %v712_v29, %v265_v63  ;;  %v269_v2 = vrot.slane %v240_v19, %v268_v7  ;;  %vm289_vm0 = vcmp.eq.f32.partialorder %v723_v44, %v273_v12 }
 0x159   :  { %v298_v11 = vsel %vm287_vm14, %v292_v25, 8  ;;  %v300_v22 = vsel %vm289_vm0, %v292_v25, 8 }
 0x15a   :  { %308 = vperm.xlu1 %481, %v295_v5   ;;  %vm288_vm15 = vcmp.eq.f32.partialorder %v718_v39, %v269_v2 }
 0x15b   :  { %v299_v14 = vsel %vm288_vm15, %v292_v25, 8 }
 0x15e   :  { %311 = vperm.xlu1 %481, %v296_v0  }
 0x162   :  { %314 = vperm.xlu1 %481, %v297_v9  }
 0x166   :  { %317 = vperm.xlu1 %481, %v298_v11  }
 0x16a   :  { %320 = vperm.xlu1 %481, %v299_v14  }
 0x16e   :  { %323 = vperm.xlu1 %481, %v300_v22  }
 0x1d1   :  { %v306_v15 = vpop.permute.xlu1 %305  ;;  %v303_v23 = vpop.permute.xlu0 %302 }
 0x1d2   :  { %v332_v21 = vrot.slane %v306_v15, %v682_v62  ;;  %v328_v3 = vrot.slane %v303_v23, %v682_v62 }
 0x1d4   :  { %v357_v44 = vsel %vm222_vm1, %v332_v21, %v328_v3 }
 0x1d5   :  { %v309_v16 = vpop.permute.xlu1 %308 }
 0x1d6   :  { %v336_v24 = vrot.slane %v309_v16, %v682_v62 }
 0x1d8   :  { %v358_v28 = vsel %vm224_vm2, %v336_v24, %v357_v44 }
 0x1d9   :  { %v312_v17 = vpop.permute.xlu1 %311 }
 0x1da   :  { %v340_v39 = vrot.slane %v312_v17, %v682_v62 }
 0x1dc   :  { %v359_v33 = vsel %vm226_vm3, %v340_v39, %v358_v28 }
 0x1dd   :  { %v315_v20 = vpop.permute.xlu1 %314 }
 0x1de   :  { %v344_v27 = vrot.slane %v315_v20, %v682_v62 }
 0x1e0   :  { %v360_v36 = vsel %vm228_vm4, %v344_v27, %v359_v33 }
 0x1e1   :  { %v318_v29 = vpop.permute.xlu1 %317 }
 0x1e2   :  { %v348_v32 = vrot.slane %v318_v29, %v682_v62 }
 0x1e4   :  { %v361_v40 = vsel %vm230_vm5, %v348_v32, %v360_v36 }
 0x1e5   :  { %v321_v31 = vpop.permute.xlu1 %320 }
 0x1e6   :  { %v352_v30 = vrot.slane %v321_v31, %v682_v62 }
 0x1e8   :  { %v362_v41 = vsel %vm232_vm6, %v352_v30, %v361_v40 }
 0x1e9   :  { %v324_v38 = vpop.permute.xlu1 %323 }
 0x1ea   :  { %v356_v43 = vrot.slane %v324_v38, %v682_v62 }
 0x1ec   :  { %v363_v42 = vsel %vm234_vm7, %v356_v43, %v362_v41 }
 0x1ed   :  { %v364_v35 = vsel %vm237_vm8, %v363_v42, 2147483647 }
 0x1ee   :  { %v366_v47 = vshra.s32 %v364_v35, 16  ;;  %v365_v49 = vand.u32 65535, %v364_v35 }
 0x1f0   :  { %v368_v48 = vcvt.s32.f32 %v366_v47  ;;  %v367_v52 = vcvt.s32.f32 %v365_v49 }
 0x1f2   :  { %369 = vmin.xlane.f32.xlu1 %v368_v48 }
 0x27b   :  { %v370_v50 = vpop.xlane.xlu1 %369 }
 0x27c   :  { %vm371_vm1 = vcmp.eq.f32.partialorder %v368_v48, %v370_v50 }
 0x27d   :  { %v372_v53 = vsel %vm371_vm1, %v367_v52, inf }
 0x27e   :  { %373 = vmin.xlane.f32.xlu0 %v372_v53 }
 0x27f   :  { %550 = shalt.err (!%p547_p0)
}
 0x280   :  { %464 = dma.vmem_to_hbm [thread:$0]  %s459_s1, 1024, %s808_s3, [#allocation4], %s567_s20, %s567_s20, %s568_s21   ;;  %v376_v62 = vcvt.f32.s32 %v370_v50 }
 0x282   :  { %v377_v55 = vshll.u32 %v376_v62, 16 }
 0x307   :  { %v374_v45 = vpop.xlane.xlu0 %373 }
 0x308   :  { %v375_v56 = vcvt.f32.s32 %v374_v45 }
 0x30a   :  { %v378_v51 = vadd.s32 %v377_v55, %v375_v56 }
 0x30c   :  { %442 = vst [vmem:[%s807_s2] sm:$0xff] %v378_v51 }
 0x30d   :  { %563 = dma.done.wait [#allocation4], 1024  }
 0x30e   :  { %564 = vsyncadd [#allocation4], 4294966272 }
 0x30f   :  { %470 = vsyncpa [#allocation3], 1 }
 0x310   :  { %471 = vsyncpa [#allocation6], 1 }
 0x311   :  { %472 = vsyncpa [#allocation4], 1 }

</bundles_post_ra>
